<compile_context>
chip_gen: v7x
topology: tpu7x:2x2x1
jax: 0.10.0
libtpu: 0.0.40
codegen_flags: <defaults>
</compile_context>

<pallas_src>
import jax
import jax.numpy as jnp
from jax import lax
from jax.experimental import pallas as pl
from jax.experimental.pallas import tpu as pltpu


def intend_kernel(x_ref, wih_ref, whh_ref, bias_ref, out_ref):
    TB, D = x_ref.shape              # time-major flattened: (T*B_pad, D)
    Bp, H = out_ref.shape            # padded batch, hidden size
    T = TB // Bp

    # BN (eval) + Dropout (identity) were already folded into x in the wrapper.
    x = x_ref[...]                                                   # (T*Bp, D)

    # One fused MXU dot for the input projection of all timesteps and all
    # three gates (PyTorch gate column order [r, z, n]).
    gi = jnp.dot(x, wih_ref[...], preferred_element_type=jnp.float32)  # (T*Bp, 3H)

    # Bias rows: [b_r = b_ih_r+b_hh_r, b_z = b_ih_z+b_hh_z, b_in, b_hn].
    b_r = bias_ref[0:1, :]
    b_z = bias_ref[1:2, :]
    b_in = bias_ref[2:3, :]
    b_hn = bias_ref[3:4, :]

    # Gate-column slicing + bias folds paid ONCE, outside the serial loop.
    gi_r = gi[:, 0:H] + b_r
    gi_z = gi[:, H:2 * H] + b_z
    gi_n = gi[:, 2 * H:3 * H] + b_in

    # Per-gate hidden weights, sliced once from the packed (3, H, H) slab.
    whh_r = whh_ref[0]               # (H, H)
    whh_z = whh_ref[1]
    whh_n = whh_ref[2]

    # Serial GRU recurrence; h_0 = zeros (PyTorch default). T is static and
    # small, so the loop is fully unrolled and h stays in vregs. Every slice
    # start (t * Bp) is a multiple of 8 -> sublane-aligned, no layout ops.
    h = jnp.zeros((Bp, H), jnp.float32)
    for t in range(T):
        lo = t * Bp
        gh_r = jnp.dot(h, whh_r, preferred_element_type=jnp.float32)
        gh_z = jnp.dot(h, whh_z, preferred_element_type=jnp.float32)
        gh_n = jnp.dot(h, whh_n, preferred_element_type=jnp.float32) + b_hn
        # PyTorch GRU gate order [r, z, n]; b_hh_n stays inside the r product.
        r = jax.nn.sigmoid(gi_r[lo:lo + Bp] + gh_r)
        z = jax.nn.sigmoid(gi_z[lo:lo + Bp] + gh_z)
        n = jnp.tanh(gi_n[lo:lo + Bp] + r * gh_n)
        h = (1.0 - z) * n + z * h

    out_ref[...] = h
    # TODO(synk): `activation` is None in this config; if supplied it would be
    # applied to h here before the final store.


def intend_forward(feat, params):
    """feat: (B, T, D) float32 -> (B, H) float32 (== intend.squeeze(0))."""
    B, T, D = feat.shape
    H = params["w_hh"].shape[1]
    eps = 1e-5
    B_pad = ((B + 7) // 8) * 8       # sublane-align the batch dimension

    # BatchNorm1d(seq_len) eval-mode affine, fused into the transpose copy of
    # feat that the wrapper needs anyway (free — not the pre-scale anti-pattern).
    scale_t = params["gamma"] * lax.rsqrt(params["running_var"] + eps)   # (T,)
    shift_t = params["beta"] - params["running_mean"] * scale_t          # (T,)
    xbn = feat * scale_t[None, :, None] + shift_t[None, :, None]         # (B, T, D)

    # Time-major slab (T, B_pad, D) -> (T*B_pad, D); padded rows are zeros.
    x_tm = jnp.transpose(xbn, (1, 0, 2))
    if B_pad > B:
        x_tm = jnp.pad(x_tm, ((0, 0), (0, B_pad - B), (0, 0)))
    x2 = x_tm.reshape(T * B_pad, D)

    # Pack GRU weights (PyTorch layout: rows of w_ih/w_hh ordered [r; z; n]).
    w_ih, w_hh = params["w_ih"], params["w_hh"]          # (3H, D), (3H, H)
    b_ih, b_hh = params["b_ih"], params["b_hh"]          # (3H,), (3H,)
    wih3 = w_ih.T                                        # (D, 3H), cols [r, z, n]
    whh3 = jnp.stack([w_hh[0:H].T,
                      w_hh[H:2 * H].T,
                      w_hh[2 * H:3 * H].T], axis=0)      # (3, H, H)
    biases = jnp.stack([b_ih[0:H] + b_hh[0:H],           # r: fold both biases
                        b_ih[H:2 * H] + b_hh[H:2 * H],   # z: fold both biases
                        b_ih[2 * H:3 * H],               # n: input bias only
                        b_hh[2 * H:3 * H]], axis=0)      # n: hidden bias (gated by r)

    vmem = pl.BlockSpec(memory_space=pltpu.MemorySpace.VMEM)

    out = pl.pallas_call(
        intend_kernel,
        out_shape=jax.ShapeDtypeStruct((B_pad, H), jnp.float32),
        in_specs=[vmem,    # x     (T*B_pad, D)
                  vmem,    # wih3  (D, 3H)
                  vmem,    # whh3  (3, H, H)
                  vmem],   # biases (4, H)
        out_specs=vmem,
    )(x2, wih3, whh3, biases)

    return out[:B]


def intend_reference(feat, params):
    """Pure-JAX reference of the same forward pass (for a sanity check)."""
    eps = 1e-5
    B, T, D = feat.shape
    H = params["w_hh"].shape[1]
    x = (feat - params["running_mean"][None, :, None]) * \
        lax.rsqrt(params["running_var"][None, :, None] + eps)
    x = x * params["gamma"][None, :, None] + params["beta"][None, :, None]
    h = jnp.zeros((B, H), jnp.float32)
    for t in range(T):
        gi = x[:, t, :] @ params["w_ih"].T + params["b_ih"]
        gh = h @ params["w_hh"].T + params["b_hh"]
        r = jax.nn.sigmoid(gi[:, :H] + gh[:, :H])
        z = jax.nn.sigmoid(gi[:, H:2 * H] + gh[:, H:2 * H])
        n = jnp.tanh(gi[:, 2 * H:] + r * gh[:, 2 * H:])
        h = (1.0 - z) * n + z * h
    return h


if __name__ == "__main__":
    # Small shapes consistent with the module:
    #   batch B=4, seq_len T=8, input_dim D=16, output_dim H=32
    B, T, D, H = 4, 8, 16, 32

    key = jax.random.PRNGKey(0)
    keys = jax.random.split(key, 10)
    bound = 1.0 / jnp.sqrt(jnp.float32(H))

    params = {
        # GRU parameters (PyTorch layout: (3H, D), (3H, H), (3H,), (3H,))
        "w_ih": jax.random.uniform(keys[0], (3 * H, D), jnp.float32, -bound, bound),
        "w_hh": jax.random.uniform(keys[1], (3 * H, H), jnp.float32, -bound, bound),
        "b_ih": jax.random.uniform(keys[2], (3 * H,), jnp.float32, -bound, bound),
        "b_hh": jax.random.uniform(keys[3], (3 * H,), jnp.float32, -bound, bound),
        # BatchNorm1d(seq_len) parameters / running stats
        "gamma": jax.random.uniform(keys[4], (T,), jnp.float32, 0.5, 1.5),
        "beta": 0.1 * jax.random.normal(keys[5], (T,), jnp.float32),
        "running_mean": 0.2 * jax.random.normal(keys[6], (T,), jnp.float32),
        "running_var": jax.random.uniform(keys[7], (T,), jnp.float32, 0.5, 1.5),
    }

    feat = jax.random.normal(keys[8], (B, T, D), jnp.float32)

    out = intend_forward(feat, params)
    out = jax.block_until_ready(out)

    ref = intend_reference(feat, params)
    assert out.shape == (B, H)
    assert jnp.allclose(out, ref, atol=1e-4, rtol=1e-4), "mismatch vs reference"

    print("KERNEL_OK")
</pallas_src>

<mosaic_0001>
module attributes {stable_mosaic.version = 11 : i64} {
  func.func @intend_kernel(%arg0: memref<64x16xf32, #tpu.memory_space<vmem>>, %arg1: memref<16x96xf32, #tpu.memory_space<vmem>>, %arg2: memref<3x32x32xf32, #tpu.memory_space<vmem>>, %arg3: memref<4x32xf32, #tpu.memory_space<vmem>>, %arg4: memref<8x32xf32, #tpu.memory_space<vmem>>) attributes {dimension_semantics = [], scalar_prefetch = 0 : i64, scratch_operands = 0 : i64, tpu.core_type = #tpu.core_type<tc>} {
    %c0 = arith.constant 0 : index
    %c0_0 = arith.constant 0 : index
    %0 = vector.load %arg0[%c0, %c0_0] : memref<64x16xf32, #tpu.memory_space<vmem>>, vector<64x16xf32>
    %c0_1 = arith.constant 0 : index
    %c0_2 = arith.constant 0 : index
    %1 = vector.load %arg1[%c0_1, %c0_2] : memref<16x96xf32, #tpu.memory_space<vmem>>, vector<16x96xf32>
    %cst = arith.constant dense<0.000000e+00> : vector<64x96xf32>
    %2 = tpu.matmul %0, %1, %cst {dimension_numbers = #tpu.dot_dimension_numbers<[1], [0], [0], [1], [0, 0, 1, 1], [], []>} : vector<64x16xf32>, vector<16x96xf32>, vector<64x96xf32> -> vector<64x96xf32>
    %c0_3 = arith.constant 0 : index
    %c0_4 = arith.constant 0 : index
    %3 = vector.load %arg3[%c0_3, %c0_4] : memref<4x32xf32, #tpu.memory_space<vmem>>, vector<1x32xf32>
    %c1 = arith.constant 1 : index
    %c0_5 = arith.constant 0 : index
    %4 = vector.load %arg3[%c1, %c0_5] : memref<4x32xf32, #tpu.memory_space<vmem>>, vector<1x32xf32>
    %c2 = arith.constant 2 : index
    %c0_6 = arith.constant 0 : index
    %5 = vector.load %arg3[%c2, %c0_6] : memref<4x32xf32, #tpu.memory_space<vmem>>, vector<1x32xf32>
    %c3 = arith.constant 3 : index
    %c0_7 = arith.constant 0 : index
    %6 = vector.load %arg3[%c3, %c0_7] : memref<4x32xf32, #tpu.memory_space<vmem>>, vector<1x32xf32>
    %7 = vector.extract_strided_slice %2 {offsets = [0, 0], sizes = [64, 32], strides = [1, 1]} : vector<64x96xf32> to vector<64x32xf32>
    %8 = vector.broadcast %3 : vector<1x32xf32> to vector<64x32xf32>
    %9 = arith.addf %7, %8 : vector<64x32xf32>
    %10 = vector.extract_strided_slice %2 {offsets = [0, 32], sizes = [64, 32], strides = [1, 1]} : vector<64x96xf32> to vector<64x32xf32>
    %11 = vector.broadcast %4 : vector<1x32xf32> to vector<64x32xf32>
    %12 = arith.addf %10, %11 : vector<64x32xf32>
    %13 = vector.extract_strided_slice %2 {offsets = [0, 64], sizes = [64, 32], strides = [1, 1]} : vector<64x96xf32> to vector<64x32xf32>
    %14 = vector.broadcast %5 : vector<1x32xf32> to vector<64x32xf32>
    %15 = arith.addf %13, %14 : vector<64x32xf32>
    %c0_8 = arith.constant 0 : index
    %c0_9 = arith.constant 0 : index
    %c0_10 = arith.constant 0 : index
    %16 = vector.load %arg2[%c0_8, %c0_9, %c0_10] : memref<3x32x32xf32, #tpu.memory_space<vmem>>, vector<1x32x32xf32>
    %17 = vector.shape_cast %16 : vector<1x32x32xf32> to vector<32x32xf32>
    %c1_11 = arith.constant 1 : index
    %c0_12 = arith.constant 0 : index
    %c0_13 = arith.constant 0 : index
    %18 = vector.load %arg2[%c1_11, %c0_12, %c0_13] : memref<3x32x32xf32, #tpu.memory_space<vmem>>, vector<1x32x32xf32>
    %19 = vector.shape_cast %18 : vector<1x32x32xf32> to vector<32x32xf32>
    %c2_14 = arith.constant 2 : index
    %c0_15 = arith.constant 0 : index
    %c0_16 = arith.constant 0 : index
    %20 = vector.load %arg2[%c2_14, %c0_15, %c0_16] : memref<3x32x32xf32, #tpu.memory_space<vmem>>, vector<1x32x32xf32>
    %21 = vector.shape_cast %20 : vector<1x32x32xf32> to vector<32x32xf32>
    %cst_17 = arith.constant 0.000000e+00 : f32
    %22 = vector.broadcast %cst_17 : f32 to vector<8x32xf32>
    %cst_18 = arith.constant dense<0.000000e+00> : vector<8x32xf32>
    %23 = tpu.matmul %22, %17, %cst_18 {dimension_numbers = #tpu.dot_dimension_numbers<[1], [0], [0], [1], [0, 0, 1, 1], [], []>} : vector<8x32xf32>, vector<32x32xf32>, vector<8x32xf32> -> vector<8x32xf32>
    %cst_19 = arith.constant dense<0.000000e+00> : vector<8x32xf32>
    %24 = tpu.matmul %22, %19, %cst_19 {dimension_numbers = #tpu.dot_dimension_numbers<[1], [0], [0], [1], [0, 0, 1, 1], [], []>} : vector<8x32xf32>, vector<32x32xf32>, vector<8x32xf32> -> vector<8x32xf32>
    %cst_20 = arith.constant dense<0.000000e+00> : vector<8x32xf32>
    %25 = tpu.matmul %22, %21, %cst_20 {dimension_numbers = #tpu.dot_dimension_numbers<[1], [0], [0], [1], [0, 0, 1, 1], [], []>} : vector<8x32xf32>, vector<32x32xf32>, vector<8x32xf32> -> vector<8x32xf32>
    %26 = vector.broadcast %6 : vector<1x32xf32> to vector<8x32xf32>
    %27 = arith.addf %25, %26 : vector<8x32xf32>
    %28 = vector.extract_strided_slice %9 {offsets = [0, 0], sizes = [8, 32], strides = [1, 1]} : vector<64x32xf32> to vector<8x32xf32>
    %29 = arith.addf %28, %23 : vector<8x32xf32>
    %30 = arith.negf %29 : vector<8x32xf32>
    %31 = math.exp %30 : vector<8x32xf32>
    %cst_21 = arith.constant 1.000000e+00 : f32
    %32 = vector.broadcast %cst_21 : f32 to vector<8x32xf32>
    %33 = arith.addf %32, %31 : vector<8x32xf32>
    %34 = arith.divf %32, %33 : vector<8x32xf32>
    %35 = vector.extract_strided_slice %12 {offsets = [0, 0], sizes = [8, 32], strides = [1, 1]} : vector<64x32xf32> to vector<8x32xf32>
    %36 = arith.addf %35, %24 : vector<8x32xf32>
    %37 = arith.negf %36 : vector<8x32xf32>
    %38 = math.exp %37 : vector<8x32xf32>
    %cst_22 = arith.constant 1.000000e+00 : f32
    %39 = vector.broadcast %cst_22 : f32 to vector<8x32xf32>
    %40 = arith.addf %39, %38 : vector<8x32xf32>
    %41 = arith.divf %39, %40 : vector<8x32xf32>
    %42 = vector.extract_strided_slice %15 {offsets = [0, 0], sizes = [8, 32], strides = [1, 1]} : vector<64x32xf32> to vector<8x32xf32>
    %43 = arith.mulf %34, %27 : vector<8x32xf32>
    %44 = arith.addf %42, %43 : vector<8x32xf32>
    %45 = math.tanh %44 : vector<8x32xf32>
    %cst_23 = arith.constant 1.000000e+00 : f32
    %46 = vector.broadcast %cst_23 : f32 to vector<8x32xf32>
    %47 = arith.subf %46, %41 : vector<8x32xf32>
    %48 = arith.mulf %47, %45 : vector<8x32xf32>
    %49 = arith.mulf %41, %22 : vector<8x32xf32>
    %50 = arith.addf %48, %49 : vector<8x32xf32>
    %cst_24 = arith.constant dense<0.000000e+00> : vector<8x32xf32>
    %51 = tpu.matmul %50, %17, %cst_24 {dimension_numbers = #tpu.dot_dimension_numbers<[1], [0], [0], [1], [0, 0, 1, 1], [], []>} : vector<8x32xf32>, vector<32x32xf32>, vector<8x32xf32> -> vector<8x32xf32>
    %cst_25 = arith.constant dense<0.000000e+00> : vector<8x32xf32>
    %52 = tpu.matmul %50, %19, %cst_25 {dimension_numbers = #tpu.dot_dimension_numbers<[1], [0], [0], [1], [0, 0, 1, 1], [], []>} : vector<8x32xf32>, vector<32x32xf32>, vector<8x32xf32> -> vector<8x32xf32>
    %cst_26 = arith.constant dense<0.000000e+00> : vector<8x32xf32>
    %53 = tpu.matmul %50, %21, %cst_26 {dimension_numbers = #tpu.dot_dimension_numbers<[1], [0], [0], [1], [0, 0, 1, 1], [], []>} : vector<8x32xf32>, vector<32x32xf32>, vector<8x32xf32> -> vector<8x32xf32>
    %54 = vector.broadcast %6 : vector<1x32xf32> to vector<8x32xf32>
    %55 = arith.addf %53, %54 : vector<8x32xf32>
    %56 = vector.extract_strided_slice %9 {offsets = [8, 0], sizes = [8, 32], strides = [1, 1]} : vector<64x32xf32> to vector<8x32xf32>
    %57 = arith.addf %56, %51 : vector<8x32xf32>
    %58 = arith.negf %57 : vector<8x32xf32>
    %59 = math.exp %58 : vector<8x32xf32>
    %cst_27 = arith.constant 1.000000e+00 : f32
    %60 = vector.broadcast %cst_27 : f32 to vector<8x32xf32>
    %61 = arith.addf %60, %59 : vector<8x32xf32>
    %62 = arith.divf %60, %61 : vector<8x32xf32>
    %63 = vector.extract_strided_slice %12 {offsets = [8, 0], sizes = [8, 32], strides = [1, 1]} : vector<64x32xf32> to vector<8x32xf32>
    %64 = arith.addf %63, %52 : vector<8x32xf32>
    %65 = arith.negf %64 : vector<8x32xf32>
    %66 = math.exp %65 : vector<8x32xf32>
    %cst_28 = arith.constant 1.000000e+00 : f32
    %67 = vector.broadcast %cst_28 : f32 to vector<8x32xf32>
    %68 = arith.addf %67, %66 : vector<8x32xf32>
    %69 = arith.divf %67, %68 : vector<8x32xf32>
    %70 = vector.extract_strided_slice %15 {offsets = [8, 0], sizes = [8, 32], strides = [1, 1]} : vector<64x32xf32> to vector<8x32xf32>
    %71 = arith.mulf %62, %55 : vector<8x32xf32>
    %72 = arith.addf %70, %71 : vector<8x32xf32>
    %73 = math.tanh %72 : vector<8x32xf32>
    %cst_29 = arith.constant 1.000000e+00 : f32
    %74 = vector.broadcast %cst_29 : f32 to vector<8x32xf32>
    %75 = arith.subf %74, %69 : vector<8x32xf32>
    %76 = arith.mulf %75, %73 : vector<8x32xf32>
    %77 = arith.mulf %69, %50 : vector<8x32xf32>
    %78 = arith.addf %76, %77 : vector<8x32xf32>
    %cst_30 = arith.constant dense<0.000000e+00> : vector<8x32xf32>
    %79 = tpu.matmul %78, %17, %cst_30 {dimension_numbers = #tpu.dot_dimension_numbers<[1], [0], [0], [1], [0, 0, 1, 1], [], []>} : vector<8x32xf32>, vector<32x32xf32>, vector<8x32xf32> -> vector<8x32xf32>
    %cst_31 = arith.constant dense<0.000000e+00> : vector<8x32xf32>
    %80 = tpu.matmul %78, %19, %cst_31 {dimension_numbers = #tpu.dot_dimension_numbers<[1], [0], [0], [1], [0, 0, 1, 1], [], []>} : vector<8x32xf32>, vector<32x32xf32>, vector<8x32xf32> -> vector<8x32xf32>
    %cst_32 = arith.constant dense<0.000000e+00> : vector<8x32xf32>
    %81 = tpu.matmul %78, %21, %cst_32 {dimension_numbers = #tpu.dot_dimension_numbers<[1], [0], [0], [1], [0, 0, 1, 1], [], []>} : vector<8x32xf32>, vector<32x32xf32>, vector<8x32xf32> -> vector<8x32xf32>
    %82 = vector.broadcast %6 : vector<1x32xf32> to vector<8x32xf32>
    %83 = arith.addf %81, %82 : vector<8x32xf32>
    %84 = vector.extract_strided_slice %9 {offsets = [16, 0], sizes = [8, 32], strides = [1, 1]} : vector<64x32xf32> to vector<8x32xf32>
    %85 = arith.addf %84, %79 : vector<8x32xf32>
    %86 = arith.negf %85 : vector<8x32xf32>
    %87 = math.exp %86 : vector<8x32xf32>
    %cst_33 = arith.constant 1.000000e+00 : f32
    %88 = vector.broadcast %cst_33 : f32 to vector<8x32xf32>
    %89 = arith.addf %88, %87 : vector<8x32xf32>
    %90 = arith.divf %88, %89 : vector<8x32xf32>
    %91 = vector.extract_strided_slice %12 {offsets = [16, 0], sizes = [8, 32], strides = [1, 1]} : vector<64x32xf32> to vector<8x32xf32>
    %92 = arith.addf %91, %80 : vector<8x32xf32>
    %93 = arith.negf %92 : vector<8x32xf32>
    %94 = math.exp %93 : vector<8x32xf32>
    %cst_34 = arith.constant 1.000000e+00 : f32
    %95 = vector.broadcast %cst_34 : f32 to vector<8x32xf32>
    %96 = arith.addf %95, %94 : vector<8x32xf32>
    %97 = arith.divf %95, %96 : vector<8x32xf32>
    %98 = vector.extract_strided_slice %15 {offsets = [16, 0], sizes = [8, 32], strides = [1, 1]} : vector<64x32xf32> to vector<8x32xf32>
    %99 = arith.mulf %90, %83 : vector<8x32xf32>
    %100 = arith.addf %98, %99 : vector<8x32xf32>
    %101 = math.tanh %100 : vector<8x32xf32>
    %cst_35 = arith.constant 1.000000e+00 : f32
    %102 = vector.broadcast %cst_35 : f32 to vector<8x32xf32>
    %103 = arith.subf %102, %97 : vector<8x32xf32>
    %104 = arith.mulf %103, %101 : vector<8x32xf32>
    %105 = arith.mulf %97, %78 : vector<8x32xf32>
    %106 = arith.addf %104, %105 : vector<8x32xf32>
    %cst_36 = arith.constant dense<0.000000e+00> : vector<8x32xf32>
    %107 = tpu.matmul %106, %17, %cst_36 {dimension_numbers = #tpu.dot_dimension_numbers<[1], [0], [0], [1], [0, 0, 1, 1], [], []>} : vector<8x32xf32>, vector<32x32xf32>, vector<8x32xf32> -> vector<8x32xf32>
    %cst_37 = arith.constant dense<0.000000e+00> : vector<8x32xf32>
    %108 = tpu.matmul %106, %19, %cst_37 {dimension_numbers = #tpu.dot_dimension_numbers<[1], [0], [0], [1], [0, 0, 1, 1], [], []>} : vector<8x32xf32>, vector<32x32xf32>, vector<8x32xf32> -> vector<8x32xf32>
    %cst_38 = arith.constant dense<0.000000e+00> : vector<8x32xf32>
    %109 = tpu.matmul %106, %21, %cst_38 {dimension_numbers = #tpu.dot_dimension_numbers<[1], [0], [0], [1], [0, 0, 1, 1], [], []>} : vector<8x32xf32>, vector<32x32xf32>, vector<8x32xf32> -> vector<8x32xf32>
    %110 = vector.broadcast %6 : vector<1x32xf32> to vector<8x32xf32>
    %111 = arith.addf %109, %110 : vector<8x32xf32>
    %112 = vector.extract_strided_slice %9 {offsets = [24, 0], sizes = [8, 32], strides = [1, 1]} : vector<64x32xf32> to vector<8x32xf32>
    %113 = arith.addf %112, %107 : vector<8x32xf32>
    %114 = arith.negf %113 : vector<8x32xf32>
    %115 = math.exp %114 : vector<8x32xf32>
    %cst_39 = arith.constant 1.000000e+00 : f32
    %116 = vector.broadcast %cst_39 : f32 to vector<8x32xf32>
    %117 = arith.addf %116, %115 : vector<8x32xf32>
    %118 = arith.divf %116, %117 : vector<8x32xf32>
    %119 = vector.extract_strided_slice %12 {offsets = [24, 0], sizes = [8, 32], strides = [1, 1]} : vector<64x32xf32> to vector<8x32xf32>
    %120 = arith.addf %119, %108 : vector<8x32xf32>
    %121 = arith.negf %120 : vector<8x32xf32>
    %122 = math.exp %121 : vector<8x32xf32>
    %cst_40 = arith.constant 1.000000e+00 : f32
    %123 = vector.broadcast %cst_40 : f32 to vector<8x32xf32>
    %124 = arith.addf %123, %122 : vector<8x32xf32>
    %125 = arith.divf %123, %124 : vector<8x32xf32>
    %126 = vector.extract_strided_slice %15 {offsets = [24, 0], sizes = [8, 32], strides = [1, 1]} : vector<64x32xf32> to vector<8x32xf32>
    %127 = arith.mulf %118, %111 : vector<8x32xf32>
    %128 = arith.addf %126, %127 : vector<8x32xf32>
    %129 = math.tanh %128 : vector<8x32xf32>
    %cst_41 = arith.constant 1.000000e+00 : f32
    %130 = vector.broadcast %cst_41 : f32 to vector<8x32xf32>
    %131 = arith.subf %130, %125 : vector<8x32xf32>
    %132 = arith.mulf %131, %129 : vector<8x32xf32>
    %133 = arith.mulf %125, %106 : vector<8x32xf32>
    %134 = arith.addf %132, %133 : vector<8x32xf32>
    %cst_42 = arith.constant dense<0.000000e+00> : vector<8x32xf32>
    %135 = tpu.matmul %134, %17, %cst_42 {dimension_numbers = #tpu.dot_dimension_numbers<[1], [0], [0], [1], [0, 0, 1, 1], [], []>} : vector<8x32xf32>, vector<32x32xf32>, vector<8x32xf32> -> vector<8x32xf32>
    %cst_43 = arith.constant dense<0.000000e+00> : vector<8x32xf32>
    %136 = tpu.matmul %134, %19, %cst_43 {dimension_numbers = #tpu.dot_dimension_numbers<[1], [0], [0], [1], [0, 0, 1, 1], [], []>} : vector<8x32xf32>, vector<32x32xf32>, vector<8x32xf32> -> vector<8x32xf32>
    %cst_44 = arith.constant dense<0.000000e+00> : vector<8x32xf32>
    %137 = tpu.matmul %134, %21, %cst_44 {dimension_numbers = #tpu.dot_dimension_numbers<[1], [0], [0], [1], [0, 0, 1, 1], [], []>} : vector<8x32xf32>, vector<32x32xf32>, vector<8x32xf32> -> vector<8x32xf32>
    %138 = vector.broadcast %6 : vector<1x32xf32> to vector<8x32xf32>
    %139 = arith.addf %137, %138 : vector<8x32xf32>
    %140 = vector.extract_strided_slice %9 {offsets = [32, 0], sizes = [8, 32], strides = [1, 1]} : vector<64x32xf32> to vector<8x32xf32>
    %141 = arith.addf %140, %135 : vector<8x32xf32>
    %142 = arith.negf %141 : vector<8x32xf32>
    %143 = math.exp %142 : vector<8x32xf32>
    %cst_45 = arith.constant 1.000000e+00 : f32
    %144 = vector.broadcast %cst_45 : f32 to vector<8x32xf32>
    %145 = arith.addf %144, %143 : vector<8x32xf32>
    %146 = arith.divf %144, %145 : vector<8x32xf32>
    %147 = vector.extract_strided_slice %12 {offsets = [32, 0], sizes = [8, 32], strides = [1, 1]} : vector<64x32xf32> to vector<8x32xf32>
    %148 = arith.addf %147, %136 : vector<8x32xf32>
    %149 = arith.negf %148 : vector<8x32xf32>
    %150 = math.exp %149 : vector<8x32xf32>
    %cst_46 = arith.constant 1.000000e+00 : f32
    %151 = vector.broadcast %cst_46 : f32 to vector<8x32xf32>
    %152 = arith.addf %151, %150 : vector<8x32xf32>
    %153 = arith.divf %151, %152 : vector<8x32xf32>
    %154 = vector.extract_strided_slice %15 {offsets = [32, 0], sizes = [8, 32], strides = [1, 1]} : vector<64x32xf32> to vector<8x32xf32>
    %155 = arith.mulf %146, %139 : vector<8x32xf32>
    %156 = arith.addf %154, %155 : vector<8x32xf32>
    %157 = math.tanh %156 : vector<8x32xf32>
    %cst_47 = arith.constant 1.000000e+00 : f32
    %158 = vector.broadcast %cst_47 : f32 to vector<8x32xf32>
    %159 = arith.subf %158, %153 : vector<8x32xf32>
    %160 = arith.mulf %159, %157 : vector<8x32xf32>
    %161 = arith.mulf %153, %134 : vector<8x32xf32>
    %162 = arith.addf %160, %161 : vector<8x32xf32>
    %cst_48 = arith.constant dense<0.000000e+00> : vector<8x32xf32>
    %163 = tpu.matmul %162, %17, %cst_48 {dimension_numbers = #tpu.dot_dimension_numbers<[1], [0], [0], [1], [0, 0, 1, 1], [], []>} : vector<8x32xf32>, vector<32x32xf32>, vector<8x32xf32> -> vector<8x32xf32>
    %cst_49 = arith.constant dense<0.000000e+00> : vector<8x32xf32>
    %164 = tpu.matmul %162, %19, %cst_49 {dimension_numbers = #tpu.dot_dimension_numbers<[1], [0], [0], [1], [0, 0, 1, 1], [], []>} : vector<8x32xf32>, vector<32x32xf32>, vector<8x32xf32> -> vector<8x32xf32>
    %cst_50 = arith.constant dense<0.000000e+00> : vector<8x32xf32>
    %165 = tpu.matmul %162, %21, %cst_50 {dimension_numbers = #tpu.dot_dimension_numbers<[1], [0], [0], [1], [0, 0, 1, 1], [], []>} : vector<8x32xf32>, vector<32x32xf32>, vector<8x32xf32> -> vector<8x32xf32>
    %166 = vector.broadcast %6 : vector<1x32xf32> to vector<8x32xf32>
    %167 = arith.addf %165, %166 : vector<8x32xf32>
    %168 = vector.extract_strided_slice %9 {offsets = [40, 0], sizes = [8, 32], strides = [1, 1]} : vector<64x32xf32> to vector<8x32xf32>
    %169 = arith.addf %168, %163 : vector<8x32xf32>
    %170 = arith.negf %169 : vector<8x32xf32>
    %171 = math.exp %170 : vector<8x32xf32>
    %cst_51 = arith.constant 1.000000e+00 : f32
    %172 = vector.broadcast %cst_51 : f32 to vector<8x32xf32>
    %173 = arith.addf %172, %171 : vector<8x32xf32>
    %174 = arith.divf %172, %173 : vector<8x32xf32>
    %175 = vector.extract_strided_slice %12 {offsets = [40, 0], sizes = [8, 32], strides = [1, 1]} : vector<64x32xf32> to vector<8x32xf32>
    %176 = arith.addf %175, %164 : vector<8x32xf32>
    %177 = arith.negf %176 : vector<8x32xf32>
    %178 = math.exp %177 : vector<8x32xf32>
    %cst_52 = arith.constant 1.000000e+00 : f32
    %179 = vector.broadcast %cst_52 : f32 to vector<8x32xf32>
    %180 = arith.addf %179, %178 : vector<8x32xf32>
    %181 = arith.divf %179, %180 : vector<8x32xf32>
    %182 = vector.extract_strided_slice %15 {offsets = [40, 0], sizes = [8, 32], strides = [1, 1]} : vector<64x32xf32> to vector<8x32xf32>
    %183 = arith.mulf %174, %167 : vector<8x32xf32>
    %184 = arith.addf %182, %183 : vector<8x32xf32>
    %185 = math.tanh %184 : vector<8x32xf32>
    %cst_53 = arith.constant 1.000000e+00 : f32
    %186 = vector.broadcast %cst_53 : f32 to vector<8x32xf32>
    %187 = arith.subf %186, %181 : vector<8x32xf32>
    %188 = arith.mulf %187, %185 : vector<8x32xf32>
    %189 = arith.mulf %181, %162 : vector<8x32xf32>
    %190 = arith.addf %188, %189 : vector<8x32xf32>
    %cst_54 = arith.constant dense<0.000000e+00> : vector<8x32xf32>
    %191 = tpu.matmul %190, %17, %cst_54 {dimension_numbers = #tpu.dot_dimension_numbers<[1], [0], [0], [1], [0, 0, 1, 1], [], []>} : vector<8x32xf32>, vector<32x32xf32>, vector<8x32xf32> -> vector<8x32xf32>
    %cst_55 = arith.constant dense<0.000000e+00> : vector<8x32xf32>
    %192 = tpu.matmul %190, %19, %cst_55 {dimension_numbers = #tpu.dot_dimension_numbers<[1], [0], [0], [1], [0, 0, 1, 1], [], []>} : vector<8x32xf32>, vector<32x32xf32>, vector<8x32xf32> -> vector<8x32xf32>
    %cst_56 = arith.constant dense<0.000000e+00> : vector<8x32xf32>
    %193 = tpu.matmul %190, %21, %cst_56 {dimension_numbers = #tpu.dot_dimension_numbers<[1], [0], [0], [1], [0, 0, 1, 1], [], []>} : vector<8x32xf32>, vector<32x32xf32>, vector<8x32xf32> -> vector<8x32xf32>
    %194 = vector.broadcast %6 : vector<1x32xf32> to vector<8x32xf32>
    %195 = arith.addf %193, %194 : vector<8x32xf32>
    %196 = vector.extract_strided_slice %9 {offsets = [48, 0], sizes = [8, 32], strides = [1, 1]} : vector<64x32xf32> to vector<8x32xf32>
    %197 = arith.addf %196, %191 : vector<8x32xf32>
    %198 = arith.negf %197 : vector<8x32xf32>
    %199 = math.exp %198 : vector<8x32xf32>
    %cst_57 = arith.constant 1.000000e+00 : f32
    %200 = vector.broadcast %cst_57 : f32 to vector<8x32xf32>
    %201 = arith.addf %200, %199 : vector<8x32xf32>
    %202 = arith.divf %200, %201 : vector<8x32xf32>
    %203 = vector.extract_strided_slice %12 {offsets = [48, 0], sizes = [8, 32], strides = [1, 1]} : vector<64x32xf32> to vector<8x32xf32>
    %204 = arith.addf %203, %192 : vector<8x32xf32>
    %205 = arith.negf %204 : vector<8x32xf32>
    %206 = math.exp %205 : vector<8x32xf32>
    %cst_58 = arith.constant 1.000000e+00 : f32
    %207 = vector.broadcast %cst_58 : f32 to vector<8x32xf32>
    %208 = arith.addf %207, %206 : vector<8x32xf32>
    %209 = arith.divf %207, %208 : vector<8x32xf32>
    %210 = vector.extract_strided_slice %15 {offsets = [48, 0], sizes = [8, 32], strides = [1, 1]} : vector<64x32xf32> to vector<8x32xf32>
    %211 = arith.mulf %202, %195 : vector<8x32xf32>
    %212 = arith.addf %210, %211 : vector<8x32xf32>
    %213 = math.tanh %212 : vector<8x32xf32>
    %cst_59 = arith.constant 1.000000e+00 : f32
    %214 = vector.broadcast %cst_59 : f32 to vector<8x32xf32>
    %215 = arith.subf %214, %209 : vector<8x32xf32>
    %216 = arith.mulf %215, %213 : vector<8x32xf32>
    %217 = arith.mulf %209, %190 : vector<8x32xf32>
    %218 = arith.addf %216, %217 : vector<8x32xf32>
    %cst_60 = arith.constant dense<0.000000e+00> : vector<8x32xf32>
    %219 = tpu.matmul %218, %17, %cst_60 {dimension_numbers = #tpu.dot_dimension_numbers<[1], [0], [0], [1], [0, 0, 1, 1], [], []>} : vector<8x32xf32>, vector<32x32xf32>, vector<8x32xf32> -> vector<8x32xf32>
    %cst_61 = arith.constant dense<0.000000e+00> : vector<8x32xf32>
    %220 = tpu.matmul %218, %19, %cst_61 {dimension_numbers = #tpu.dot_dimension_numbers<[1], [0], [0], [1], [0, 0, 1, 1], [], []>} : vector<8x32xf32>, vector<32x32xf32>, vector<8x32xf32> -> vector<8x32xf32>
    %cst_62 = arith.constant dense<0.000000e+00> : vector<8x32xf32>
    %221 = tpu.matmul %218, %21, %cst_62 {dimension_numbers = #tpu.dot_dimension_numbers<[1], [0], [0], [1], [0, 0, 1, 1], [], []>} : vector<8x32xf32>, vector<32x32xf32>, vector<8x32xf32> -> vector<8x32xf32>
    %222 = vector.broadcast %6 : vector<1x32xf32> to vector<8x32xf32>
    %223 = arith.addf %221, %222 : vector<8x32xf32>
    %224 = vector.extract_strided_slice %9 {offsets = [56, 0], sizes = [8, 32], strides = [1, 1]} : vector<64x32xf32> to vector<8x32xf32>
    %225 = arith.addf %224, %219 : vector<8x32xf32>
    %226 = arith.negf %225 : vector<8x32xf32>
    %227 = math.exp %226 : vector<8x32xf32>
    %cst_63 = arith.constant 1.000000e+00 : f32
    %228 = vector.broadcast %cst_63 : f32 to vector<8x32xf32>
    %229 = arith.addf %228, %227 : vector<8x32xf32>
    %230 = arith.divf %228, %229 : vector<8x32xf32>
    %231 = vector.extract_strided_slice %12 {offsets = [56, 0], sizes = [8, 32], strides = [1, 1]} : vector<64x32xf32> to vector<8x32xf32>
    %232 = arith.addf %231, %220 : vector<8x32xf32>
    %233 = arith.negf %232 : vector<8x32xf32>
    %234 = math.exp %233 : vector<8x32xf32>
    %cst_64 = arith.constant 1.000000e+00 : f32
    %235 = vector.broadcast %cst_64 : f32 to vector<8x32xf32>
    %236 = arith.addf %235, %234 : vector<8x32xf32>
    %237 = arith.divf %235, %236 : vector<8x32xf32>
    %238 = vector.extract_strided_slice %15 {offsets = [56, 0], sizes = [8, 32], strides = [1, 1]} : vector<64x32xf32> to vector<8x32xf32>
    %239 = arith.mulf %230, %223 : vector<8x32xf32>
    %240 = arith.addf %238, %239 : vector<8x32xf32>
    %241 = math.tanh %240 : vector<8x32xf32>
    %cst_65 = arith.constant 1.000000e+00 : f32
    %242 = vector.broadcast %cst_65 : f32 to vector<8x32xf32>
    %243 = arith.subf %242, %237 : vector<8x32xf32>
    %244 = arith.mulf %243, %241 : vector<8x32xf32>
    %245 = arith.mulf %237, %218 : vector<8x32xf32>
    %246 = arith.addf %244, %245 : vector<8x32xf32>
    %c0_66 = arith.constant 0 : index
    %c0_67 = arith.constant 0 : index
    %247 = vector.load %arg4[%c0_66, %c0_67] : memref<8x32xf32, #tpu.memory_space<vmem>>, vector<8x32xf32>
    tpu.vector_store %arg4[%c0_66, %c0_67], %246 {strides = array<i32>} : memref<8x32xf32, #tpu.memory_space<vmem>>, vector<8x32xf32>,
    return
  }
}

</mosaic_0001>

<bundles_post_ra>
// kernel: tpu_custom_call.1
= control target key start
LH: loop header
LB: loop body
LE: loop exit
PB: predicated region body
PF: predicated region fallthrough
CT: control target
= control target key end

     0   :  { %9 = vsyncpa [#allocation3], 0  ;;  %s3396_s0 = inlined_call_operand.vmem [shape: f32[64,16], index: 0, kind: input, shape index: {}]   ;;  %s3397_s1 = inlined_call_operand.vmem [shape: f32[16,96], index: 1, kind: input, shape index: {}]   ;;  %s3398_s2 = inlined_call_operand.hbm [shape: f32[3,32,32], index: 2, kind: input, shape index: {}]   ;;  %s3399_s3 = inlined_call_operand.vmem [shape: f32[4,32], index: 3, kind: input, shape index: {}]   ;;  %s3400_s4 = inlined_call_operand.hbm [shape: f32[8,32], index: 4, kind: output, shape index: {}]  }
   0x1   :  { %10 = vsyncpa [#allocation4], 0  ;;  %s2986_s15 = smov [#allocation2]   ;;  %s2938_s19 = scalar_lea.hbm %s3398_s2, 1536 }
   0x2   :  { %s20_s16 = sshll.u32 %s2986_s15, 4  ;;  %p2939_p0 = scmp.ne.s32.totalorder %s3398_s2, %s2938_s19  ;;  %s21_s16 = int_to_ptr.vmem [resolvable:$true] %s20_s16 }
   0x3   :  { %p2942_p1 = scmp.lt.u32.totalorder %s2938_s19, %s3398_s2 }
   0x5   :  { %p2944_p2 = pnand %p2942_p1, %p2939_p0 }
   0x7   :  { %2947 = shalt.err (!%p2944_p2)
}
   0x8   :  { %s2948_s24 = scalar_lea.vmem %s21_s16, 1536  ;;  %p2953_p4 = scmp.lt.s32.totalorder %s21_s16, %s21_s16 }
   0x9   :  { %p2949_p3 = scmp.ne.s32.totalorder %s21_s16, %s2948_s24  ;;  %p2954_p5 = scmp.lt.s32.totalorder %s2948_s24, %s2948_s24 }
   0xb   :  { %p2955_p6 = por %p2954_p5, %p2953_p4 }
   0xd   :  { %p2956_p7 = pnand %p2955_p6, %p2949_p3 }
   0xf   :  { %2959 = shalt.err (!%p2956_p7)
}
  0x10   :  { %s2987_s25 = smov 128   ;;  %s2988_s26 = smov 8  }
  0x11   :  { %26 = dma.hbm_to_vmem [thread:$0]  %s3398_s2, 1536, %s21_s16, [#allocation3], %s2987_s25, %s2987_s25, %s2988_s26  }
  0x12   :  { %2982 = dma.done.wait [#allocation3], 1536  }
  0x13   :  { %2983 = vsyncadd [#allocation3], 4294965760  ;;  %v2989_v0 = vmov 0.0|0.0   ;;  %vm2990_vm0 = vmmov 0   ;;  %v2991_v1 = vmov 0.0   ;;  %vm42_vm1 = vcmask 130048  }
  0x14   :  { %2704 = vmatprep.subr.bf16.mxu1 %v2989_v0  ;;  %2444 = vmatprep.mubr.msk.f32.mxu1 %vm2990_vm0, %v2991_v1  ;;  %v40_v2 = vld [vmem:[%s3397_s1] sm:$0xff]  ;;  %v41_v3 = vld [vmem:[%s3397_s1 + $0x8] sm:$0xff]  ;;  %v222_v9 = vld [vmem:[#allocation2 + $0x10] sm:$0xff]  ;;  %s2992_s17 = smov 64   ;;  %s2993_s24 = smov 32   ;;  %vm234_vm2 = vcmask 261120  }
  0x15   :  { %v220_v4 = vld [vmem:[#allocation2] sm:$0xff]  ;;  %v2700_v5 = vpack.c.bf16 %v41_v3, %v40_v2  ;;  %v221_v6 = vld [vmem:[#allocation2 + $0x8] sm:$0xff]  ;;  %v223_v10 = vld [vmem:[#allocation2 + $0x18] sm:$0xff]  ;;  %s2994_s30 = smov 96  }
  0x16   :  { %v32_v7 = vld [vmem:[%s3396_s0] sm:$0xff]  ;;  %v3045_v8 = vpack.c.bf16 %v221_v6, %v220_v4  ;;  %v33_v11 = vld [vmem:[%s3396_s0 + $0x8] sm:$0xff]  ;;  %v3052_v12 = vpack.c.bf16 %v223_v10, %v222_v9  ;;  %v34_v18 = vld [vmem:[%s3396_s0 + $0x10] sm:$0xff] }
  0x17   :  { %2424 = vmatprep.mubr.msk.f32.mxu0 %vm42_vm1, %v32_v7  ;;  %2701 = vmatprep.subr.bf16.mxu0 %v2700_v5  ;;  %v230_v13 = vld [vmem:[#allocation2 + $0x40] sm:$0xff]  ;;  %v231_v14 = vld [vmem:[#allocation2 + $0x48] sm:$0xff]  ;;  %v232_v19 = vld [vmem:[#allocation2 + $0x50] sm:$0xff] }
  0x18   :  { %2706 = vmatpush3.bf16.msra.mxu1 %v3045_v8  ;;  %2703 = vmatpush3.bf16.msra.mxu0 %v2700_v5  ;;  %v225_v15 = vld [vmem:[#allocation2 + $0x20] sm:$0xff]  ;;  %v226_v16 = vld [vmem:[#allocation2 + $0x28] sm:$0xff]  ;;  %v3056_v17 = vpack.c.bf16 %v231_v14, %v230_v13  ;;  %v233_v20 = vld [vmem:[#allocation2 + $0x58] sm:$0xff] }
  0x19   :  { %2707 = vmatprep.subr.bf16.mxu1 %v2989_v0  ;;  %2716 = vmatprep.subr.bf16.mxu0 %v2989_v0  ;;  %v2251_v21 = vld [vmem:[%s3399_s3 + $0x2] ss:$0 sm:$0xff]  ;;  %v3066_v22 = vpack.c.bf16 %v226_v16, %v225_v15  ;;  %v35_v23 = vld [vmem:[%s3396_s0 + $0x18] sm:$0xff]  ;;  %v227_v24 = vld [vmem:[#allocation2 + $0x30] sm:$0xff]  ;;  %v3078_v27 = vpack.c.bf16 %v233_v20, %v232_v19 }
  0x1a   :  { %v228_v25 = vld [vmem:[#allocation2 + $0x38] sm:$0xff]  ;;  %v36_v26 = vld [vmem:[%s3396_s0 + $0x20] sm:$0xff]  ;;  %209 = vrot.lane.b32.xlu0 %v2251_v21, %s2992_s17  ;;  %v37_v30 = vld [vmem:[%s3396_s0 + $0x28] sm:$0xff] }
  0x1b   :  { %2425 = vmatmul.mubr.msk.f32.vlgmr.msra.gmra.mrb[0].mxu0 %vm42_vm1, %v33_v11  ;;  %v2250_v28 = vld [vmem:[%s3399_s3 + $0x1] ss:$0 sm:$0xff]  ;;  %v3087_v29 = vpack.c.bf16 %v228_v25, %v227_v24  ;;  %v38_v31 = vld [vmem:[%s3396_s0 + $0x30] sm:$0xff]  ;;  %v39_v32 = vld [vmem:[%s3396_s0 + $0x38] sm:$0xff] }
  0x1c   :  { %2709 = vmatpush3.bf16.msra.mxu1 %v3052_v12  ;;  %2718 = vmatpush3.bf16.msra.mxu0 %v3056_v17  ;;  %v2249_v33 = vld [vmem:[%s3399_s3] ss:$0 sm:$0xff]  ;;  %v3168_v60 = vld [vmem:[%s3399_s3 + $0x3] ss:$0 sm:$0xff]  ;;  %s2995_s3 = smov [#allocation5]  }
  0x1d   :  { %2710 = vmatprep.subr.bf16.mxu1 %v2989_v0  ;;  %2427 = vmatprep.mubr.msk.f32.mxu0 %vm42_vm1, %v34_v18  ;;  %s2232_s5 = sshll.u32 %s2995_s3, 4  ;;  %s2233_s5 = int_to_ptr.vmem [resolvable:$true] %s2232_s5 }
  0x1e   :  { %2719 = vmatprep.subr.bf16.mxu0 %v2989_v0  ;;  %193 = vrot.lane.b32.xlu1 %v2250_v28, %s2993_s24  ;;  %s2960_s6 = scalar_lea.vmem %s2233_s5, 128  ;;  %p2965_p9 = scmp.lt.s32.totalorder %s2233_s5, %s2233_s5 }
  0x1f   :  { %2445 = vmatmul.mubr.f32.vlgmr.msra.gmra.mrb[0].mxu1 %v2991_v1  ;;  %2428 = vmatmul.mubr.msk.f32.gmra.mrb[2].mxu0 %vm42_vm1, %v35_v23  ;;  %p2961_p8 = scmp.ne.s32.totalorder %s2233_s5, %s2960_s6  ;;  %p2966_p10 = scmp.lt.s32.totalorder %s2960_s6, %s2960_s6 }
  0x20   :  { %2712 = vmatpush3.bf16.msra.mxu1 %v3066_v22  ;;  %2455 = vmatprep.mubr.msk.f32.mxu1 %vm2990_vm0, %v2991_v1 }
  0x21   :  { %2713 = vmatprep.subr.bf16.mxu1 %v2989_v0  ;;  %2430 = vmatprep.mubr.msk.f32.mxu0 %vm42_vm1, %v36_v26  ;;  %p2967_p11 = por %p2966_p10, %p2965_p9 }
  0x22   :  { %2721 = vmatpush3.bf16.msra.mxu0 %v3078_v27 }
  0x23   :  { %2431 = vmatmul.mubr.msk.f32.gmra.mrb[4].mxu0 %vm42_vm1, %v37_v30  ;;  %2728 = vmatprep.subr.bf16.mxu0 %v2989_v0  ;;  %p2968_p12 = pnand %p2967_p11, %p2961_p8 }
  0x24   :  { %2715 = vmatpush3.bf16.msra.mxu1 %v3087_v29  ;;  %2433 = vmatprep.mubr.msk.f32.mxu0 %vm42_vm1, %v38_v31 }
  0x25   :  { %2722 = vmatprep.subr.bf16.mxu1 %v2989_v0 }
  0x27   :  { %2456 = vmatmul.mubr.f32.vlgmr.msra.gmra.mrb[2].mxu1 %v2991_v1  ;;  %2434 = vmatmul.mubr.msk.f32.gmra.mrb[6].mxu0 %vm42_vm1, %v39_v32 }
  0x28   :  { %2466 = vmatprep.mubr.msk.f32.mxu0 %vm2990_vm0, %v2991_v1  ;;  %2724 = vmatpush3.bf16.msra.mxu1 %v3045_v8 }
  0x29   :  { %2725 = vmatprep.subr.bf16.mxu1 %v2989_v0  ;;  %2477 = vmatprep.mubr.msk.f32.mxu1 %vm2990_vm0, %v2991_v1 }
  0x2b   :  { %2467 = vmatmul.mubr.f32.vlgmr.msra.gmra.mrb[8].mxu0 %v2991_v1 }
  0x2c   :  { %2730 = vmatpush3.bf16.msra.mxu0 %v3066_v22  ;;  %2727 = vmatpush3.bf16.msra.mxu1 %v3052_v12 }
  0x2d   :  { %2731 = vmatprep.subr.bf16.mxu0 %v2989_v0  ;;  %2488 = vmatprep.mubr.msk.f32.mxu0 %vm2990_vm0, %v2991_v1 }
  0x2e   :  { %2734 = vmatprep.subr.bf16.mxu1 %v2989_v0 }
  0x30   :  { %2733 = vmatpush3.bf16.msra.mxu0 %v3087_v29 }
  0x31   :  { %2740 = vmatprep.subr.bf16.mxu0 %v2989_v0 }
  0x8c   :  { %v3172_v2 = vpop.permute.xlu0 %209 }
  0x90   :  { %v3176_v7 = vpop.permute.xlu1 %193 }
  0xee   :  { %v3129_v34 = vpop.f32.mrb[0].mxu0 }
  0xef   :  { %v133_v35 = vpop.f32.mrb[1].mxu0  ;;  %v3132_v36 = vadd.f32 %v3129_v34, %v2249_v33 }
  0xf0   :  { %v180_v37 = vadd.f32 %v2249_v33, %v133_v35  ;;  %v212_v3 = vadd.f32 %v3172_v2, %v133_v35  ;;  %v196_v10 = vadd.f32 %v3176_v7, %v133_v35 }
  0xf2   :  { %v304_v38 = vpop.f32.mrb[0].mxu1  ;;  %v3134_v39 = vpop.f32.mrb[2].mxu0 }
  0xf3   :  { %v452_v40 = vadd.f32 %v304_v38, %v180_v37  ;;  %v2446_v41 = vpop.f32.mrb[1].mxu1  ;;  %v3136_v42 = vpop.f32.mrb[3].mxu0  ;;  %v3139_v43 = vadd.f32 %v3134_v39, %v2249_v33 }
  0xf4   :  { %v3142_v44 = vadd.f32 %v2249_v33, %v3136_v42 }
  0xf5   :  { %v2253_v45 = vmul.f32 -1.442695, %v452_v40 }
  0xf6   :  { %v3144_v46 = vpop.f32.mrb[4].mxu0 }
  0xf7   :  { %2858 = vpow2.f32 %v2253_v45  ;;  %v3146_v47 = vpop.f32.mrb[5].mxu0  ;;  %v3149_v48 = vadd.f32 %v3144_v46, %v2249_v33 }
  0xf8   :  { %v3152_v49 = vadd.f32 %v2249_v33, %v3146_v47 }
  0xfa   :  { %v374_v50 = vpop.f32.mrb[2].mxu1  ;;  %v3154_v51 = vpop.f32.mrb[6].mxu0 }
  0xfb   :  { %460 = vrot.lane.b32.xlu1 %v374_v50, %s2993_s24  ;;  %v3157_v52 = vpop.f32.mrb[7].mxu0  ;;  %v2457_v53 = vpop.f32.mrb[3].mxu1  ;;  %v3160_v54 = vadd.f32 %v3154_v51, %v2249_v33 }
  0xfc   :  { %v3163_v55 = vadd.f32 %v2249_v33, %v3157_v52 }
  0xfe   :  { %v448_v56 = vpop.f32.mrb[8].mxu0 }
  0xff   :  { %v2468_v57 = vpop.f32.mrb[9].mxu0  ;;  %v449_v61 = vadd.f32 %v3168_v60, %v448_v56 }
 0x101   :  { %v2859_v58 = vpop.eup %2858 }
 0x102   :  { %v456_v59 = vadd.f32 1.0, %v2859_v58  ;;  %v197_v58 = vadd.f32 %v3129_v34, %v3176_v7 }
 0x104   :  { %2860 = vrcp.f32 %v456_v59 }
 0x10e   :  { %v2861_v62 = vpop.eup %2860 }
 0x10f   :  { %v470_v63 = vmul.f32 %v2861_v62, %v449_v61 }
 0x111   :  { %472 = vrot.lane.b32.xlu0 %v470_v63, %s2992_s17 }
 0x16d   :  { %v461_v9 = vpop.permute.xlu1 %460 }
 0x16e   :  { %v463_v11 = vadd.f32 %v461_v9, %v196_v10 }
 0x170   :  { %v2254_v13 = vmul.f32 -1.442695, %v463_v11 }
 0x183   :  { %v473_v4 = vpop.permute.xlu0 %472 }
 0x184   :  { %v475_v5 = vadd.f32 %v473_v4, %v212_v3 }
 0x186   :  { %2862 = vtanh.f32 %v475_v5 }
 0x187   :  { %2864 = vpow2.f32 %v2254_v13 }
 0x190   :  { %v2863_v6 = vpop.eup %2862 }
 0x191   :  { %479 = vrot.lane.b32.xlu0 %v2863_v6, %s2994_s30  ;;  %v2865_v14 = vpop.eup %2864 }
 0x192   :  { %v467_v15 = vadd.f32 1.0, %v2865_v14 }
 0x194   :  { %2866 = vrcp.f32 %v467_v15 }
 0x19e   :  { %v2867_v16 = vpop.eup %2866 }
 0x19f   :  { %v477_v18 = vsub.f32 1.0, %v2867_v16  ;;  %v483_v20 = vmul.f32 0.0, %v2867_v16 }
 0x203   :  { %v480_v19 = vpop.permute.xlu0 %479 }
 0x204   :  { %v482_v21 = vmul.f32 %v480_v19, %v477_v18 }
 0x206   :  { %v484_v23 = vadd.f32 %v483_v20, %v482_v21 }
 0x208   :  { %486 = vrot.lane.b32.xlu1 %v484_v23, %s2994_s30 }
 0x27a   :  { %v487_v24 = vpop.permute.xlu1 %486 }
 0x27b   :  { %2478 = vmatmul.mubr.msk.f32.vlgmr.msra.gmra.mrb[4].mxu1 %vm234_vm2, %v487_v24  ;;  %2489 = vmatmul.mubr.msk.f32.vlgmr.msra.gmra.mrb[10].mxu0 %vm234_vm2, %v487_v24 }
 0x27c   :  { %2736 = vmatpush3.bf16.msra.mxu1 %v3056_v17  ;;  %2499 = vmatprep.mubr.msk.f32.mxu1 %vm2990_vm0, %v2991_v1 }
 0x27d   :  { %2737 = vmatprep.subr.bf16.mxu1 %v2989_v0  ;;  %2742 = vmatpush3.bf16.msra.mxu0 %v3045_v8 }
 0x27e   :  { %2743 = vmatprep.subr.bf16.mxu0 %v2989_v0  ;;  %2510 = vmatprep.mubr.msk.f32.mxu0 %vm2990_vm0, %v2991_v1 }
 0x280   :  { %2739 = vmatpush3.bf16.msra.mxu1 %v3078_v27 }
 0x281   :  { %2746 = vmatprep.subr.bf16.mxu1 %v2989_v0  ;;  %2745 = vmatpush3.bf16.msra.mxu0 %v3052_v12 }
 0x282   :  { %2752 = vmatprep.subr.bf16.mxu0 %v2989_v0 }
 0x283   :  { %2500 = vmatmul.mubr.msk.f32.vlgmr.msra.gmra.mrb[6].mxu1 %vm234_vm2, %v487_v24 }
 0x284   :  { %2748 = vmatpush3.bf16.msra.mxu1 %v3066_v22  ;;  %2521 = vmatprep.mubr.msk.f32.mxu1 %vm2990_vm0, %v2991_v1 }
 0x285   :  { %2749 = vmatprep.subr.bf16.mxu1 %v2989_v0 }
 0x288   :  { %2751 = vmatpush3.bf16.msra.mxu1 %v3087_v29 }
 0x289   :  { %2758 = vmatprep.subr.bf16.mxu1 %v2989_v0 }
 0x34e   :  { %v556_v25 = vpop.f32.mrb[4].mxu1  ;;  %v626_v26 = vpop.f32.mrb[10].mxu0 }
 0x34f   :  { %v700_v28 = vadd.f32 %v556_v25, %v3132_v36  ;;  %v2479_v30 = vpop.f32.mrb[5].mxu1  ;;  %708 = vrot.lane.b32.xlu1 %v626_v26, %s2993_s24  ;;  %v2490_v31 = vpop.f32.mrb[11].mxu0  ;;  %v213_v36 = vadd.f32 %v3129_v34, %v3172_v2 }
 0x351   :  { %v2258_v32 = vmul.f32 -1.442695, %v700_v28 }
 0x353   :  { %2868 = vpow2.f32 %v2258_v32 }
 0x356   :  { %v696_v33 = vpop.f32.mrb[6].mxu1 }
 0x357   :  { %v2501_v35 = vpop.f32.mrb[7].mxu1  ;;  %v697_v40 = vadd.f32 %v3168_v60, %v696_v33  ;;  %v198_v33 = vadd.f32 %v3176_v7, %v3136_v42 }
 0x35d   :  { %v2869_v37 = vpop.eup %2868 }
 0x35e   :  { %v704_v38 = vadd.f32 1.0, %v2869_v37 }
 0x360   :  { %2870 = vrcp.f32 %v704_v38 }
 0x36a   :  { %v2871_v41 = vpop.eup %2870 }
 0x36b   :  { %v718_v45 = vmul.f32 %v2871_v41, %v697_v40 }
 0x36d   :  { %720 = vrot.lane.b32.xlu0 %v718_v45, %s2992_s17 }
 0x3c1   :  { %v709_v57 = vpop.permute.xlu1 %708 }
 0x3c2   :  { %v711_v59 = vadd.f32 %v709_v57, %v197_v58 }
 0x3c4   :  { %v2259_v61 = vmul.f32 -1.442695, %v711_v59 }
 0x3df   :  { %v721_v50 = vpop.permute.xlu0 %720 }
 0x3e0   :  { %v723_v53 = vadd.f32 %v721_v50, %v213_v36 }
 0x3e2   :  { %2872 = vtanh.f32 %v723_v53 }
 0x3e3   :  { %2874 = vpow2.f32 %v2259_v61 }
 0x3ec   :  { %v2873_v56 = vpop.eup %2872 }
 0x3ed   :  { %727 = vrot.lane.b32.xlu0 %v2873_v56, %s2994_s30  ;;  %v2875_v62 = vpop.eup %2874 }
 0x3ee   :  { %v715_v63 = vadd.f32 1.0, %v2875_v62 }
 0x3f0   :  { %2876 = vrcp.f32 %v715_v63 }
 0x3fa   :  { %v2877_v3 = vpop.eup %2876 }
 0x3fb   :  { %v725_v4 = vsub.f32 1.0, %v2877_v3  ;;  %v731_v9 = vmul.f32 %v2877_v3, %v484_v23 }
 0x45f   :  { %v728_v5 = vpop.permute.xlu0 %727 }
 0x460   :  { %v730_v6 = vmul.f32 %v728_v5, %v725_v4 }
 0x462   :  { %v732_v10 = vadd.f32 %v731_v9, %v730_v6 }
 0x464   :  { %734 = vrot.lane.b32.xlu1 %v732_v10, %s2994_s30 }
 0x4d6   :  { %v735_v11 = vpop.permute.xlu1 %734 }
 0x4d7   :  { %2511 = vmatmul.mubr.msk.f32.vlgmr.msra.gmra.mrb[12].mxu0 %vm234_vm2, %v735_v11  ;;  %2522 = vmatmul.mubr.msk.f32.vlgmr.msra.gmra.mrb[8].mxu1 %vm234_vm2, %v735_v11 }
 0x4d8   :  { %2754 = vmatpush3.bf16.msra.mxu0 %v3056_v17  ;;  %2532 = vmatprep.mubr.msk.f32.mxu0 %vm2990_vm0, %v2991_v1 }
 0x4d9   :  { %2755 = vmatprep.subr.bf16.mxu0 %v2989_v0  ;;  %2760 = vmatpush3.bf16.msra.mxu1 %v3045_v8 }
 0x4da   :  { %2761 = vmatprep.subr.bf16.mxu1 %v2989_v0  ;;  %2543 = vmatprep.mubr.msk.f32.mxu1 %vm2990_vm0, %v2991_v1 }
 0x4dc   :  { %2757 = vmatpush3.bf16.msra.mxu0 %v3078_v27 }
 0x4dd   :  { %2764 = vmatprep.subr.bf16.mxu0 %v2989_v0  ;;  %2763 = vmatpush3.bf16.msra.mxu1 %v3052_v12 }
 0x4de   :  { %2770 = vmatprep.subr.bf16.mxu1 %v2989_v0 }
 0x4df   :  { %2533 = vmatmul.mubr.msk.f32.vlgmr.msra.gmra.mrb[14].mxu0 %vm234_vm2, %v735_v11 }
 0x4e0   :  { %2766 = vmatpush3.bf16.msra.mxu0 %v3066_v22  ;;  %2554 = vmatprep.mubr.msk.f32.mxu0 %vm2990_vm0, %v2991_v1 }
 0x4e1   :  { %2767 = vmatprep.subr.bf16.mxu0 %v2989_v0 }
 0x4e4   :  { %2769 = vmatpush3.bf16.msra.mxu0 %v3087_v29 }
 0x4e5   :  { %2776 = vmatprep.subr.bf16.mxu0 %v2989_v0 }
 0x5aa   :  { %v804_v34 = vpop.f32.mrb[12].mxu0  ;;  %v874_v13 = vpop.f32.mrb[8].mxu1 }
 0x5ab   :  { %v948_v14 = vadd.f32 %v804_v34, %v3142_v44  ;;  %956 = vrot.lane.b32.xlu1 %v874_v13, %s2993_s24  ;;  %v2512_v15 = vpop.f32.mrb[13].mxu0  ;;  %v2523_v16 = vpop.f32.mrb[9].mxu1  ;;  %v214_v44 = vadd.f32 %v3172_v2, %v3136_v42 }
 0x5ac   :  { %v199_v16 = vadd.f32 %v3134_v39, %v3176_v7 }
 0x5ad   :  { %v2263_v18 = vmul.f32 -1.442695, %v948_v14 }
 0x5af   :  { %2878 = vpow2.f32 %v2263_v18 }
 0x5b2   :  { %v944_v19 = vpop.f32.mrb[14].mxu0 }
 0x5b3   :  { %v2534_v20 = vpop.f32.mrb[15].mxu0  ;;  %v945_v24 = vadd.f32 %v3168_v60, %v944_v19 }
 0x5b9   :  { %v2879_v21 = vpop.eup %2878 }
 0x5ba   :  { %v952_v23 = vadd.f32 1.0, %v2879_v21 }
 0x5bc   :  { %2880 = vrcp.f32 %v952_v23 }
 0x5c6   :  { %v2881_v25 = vpop.eup %2880 }
 0x5c7   :  { %v966_v26 = vmul.f32 %v2881_v25, %v945_v24 }
 0x5c9   :  { %968 = vrot.lane.b32.xlu0 %v966_v26, %s2992_s17 }
 0x61d   :  { %v957_v32 = vpop.permute.xlu1 %956 }
 0x61e   :  { %v959_v35 = vadd.f32 %v957_v32, %v198_v33 }
 0x620   :  { %v2264_v37 = vmul.f32 -1.442695, %v959_v35 }
 0x63b   :  { %v969_v28 = vpop.permute.xlu0 %968 }
 0x63c   :  { %v971_v30 = vadd.f32 %v969_v28, %v214_v44 }
 0x63e   :  { %2882 = vtanh.f32 %v971_v30 }
 0x63f   :  { %2884 = vpow2.f32 %v2264_v37 }
 0x648   :  { %v2883_v31 = vpop.eup %2882 }
 0x649   :  { %975 = vrot.lane.b32.xlu0 %v2883_v31, %s2994_s30  ;;  %v2885_v38 = vpop.eup %2884 }
 0x64a   :  { %v963_v40 = vadd.f32 1.0, %v2885_v38 }
 0x64c   :  { %2886 = vrcp.f32 %v963_v40 }
 0x656   :  { %v2887_v41 = vpop.eup %2886 }
 0x657   :  { %v973_v45 = vsub.f32 1.0, %v2887_v41  ;;  %v979_v50 = vmul.f32 %v2887_v41, %v732_v10 }
 0x6bb   :  { %v976_v36 = vpop.permute.xlu0 %975 }
 0x6bc   :  { %v978_v53 = vmul.f32 %v976_v36, %v973_v45 }
 0x6be   :  { %v980_v56 = vadd.f32 %v979_v50, %v978_v53 }
 0x6c0   :  { %982 = vrot.lane.b32.xlu1 %v980_v56, %s2994_s30 }
 0x732   :  { %v983_v57 = vpop.permute.xlu1 %982 }
 0x733   :  { %2544 = vmatmul.mubr.msk.f32.vlgmr.msra.gmra.mrb[10].mxu1 %vm234_vm2, %v983_v57  ;;  %2555 = vmatmul.mubr.msk.f32.vlgmr.msra.gmra.mrb[16].mxu0 %vm234_vm2, %v983_v57 }
 0x734   :  { %2772 = vmatpush3.bf16.msra.mxu1 %v3056_v17  ;;  %2565 = vmatprep.mubr.msk.f32.mxu1 %vm2990_vm0, %v2991_v1 }
 0x735   :  { %2773 = vmatprep.subr.bf16.mxu1 %v2989_v0  ;;  %2778 = vmatpush3.bf16.msra.mxu0 %v3045_v8 }
 0x736   :  { %2779 = vmatprep.subr.bf16.mxu0 %v2989_v0  ;;  %2576 = vmatprep.mubr.msk.f32.mxu0 %vm2990_vm0, %v2991_v1 }
 0x738   :  { %2775 = vmatpush3.bf16.msra.mxu1 %v3078_v27 }
 0x739   :  { %2782 = vmatprep.subr.bf16.mxu1 %v2989_v0  ;;  %2781 = vmatpush3.bf16.msra.mxu0 %v3052_v12 }
 0x73a   :  { %2788 = vmatprep.subr.bf16.mxu0 %v2989_v0 }
 0x73b   :  { %2566 = vmatmul.mubr.msk.f32.vlgmr.msra.gmra.mrb[12].mxu1 %vm234_vm2, %v983_v57 }
 0x73c   :  { %2784 = vmatpush3.bf16.msra.mxu1 %v3066_v22  ;;  %2587 = vmatprep.mubr.msk.f32.mxu1 %vm2990_vm0, %v2991_v1 }
 0x73d   :  { %2785 = vmatprep.subr.bf16.mxu1 %v2989_v0 }
 0x740   :  { %2787 = vmatpush3.bf16.msra.mxu1 %v3087_v29 }
 0x741   :  { %2794 = vmatprep.subr.bf16.mxu1 %v2989_v0 }
 0x806   :  { %v1052_v42 = vpop.f32.mrb[10].mxu1  ;;  %v1122_v58 = vpop.f32.mrb[16].mxu0 }
 0x807   :  { %v1196_v59 = vadd.f32 %v1052_v42, %v3139_v43  ;;  %v2545_v61 = vpop.f32.mrb[11].mxu1  ;;  %1204 = vrot.lane.b32.xlu1 %v1122_v58, %s2993_s24  ;;  %v2556_v62 = vpop.f32.mrb[17].mxu0  ;;  %v215_v43 = vadd.f32 %v3134_v39, %v3172_v2 }
 0x809   :  { %v2268_v63 = vmul.f32 -1.442695, %v1196_v59  ;;  %v200_v59 = vadd.f32 %v3176_v7, %v3146_v47 }
 0x80b   :  { %2888 = vpow2.f32 %v2268_v63 }
 0x80e   :  { %v1192_v3 = vpop.f32.mrb[12].mxu1 }
 0x80f   :  { %v2567_v4 = vpop.f32.mrb[13].mxu1  ;;  %v1193_v9 = vadd.f32 %v3168_v60, %v1192_v3 }
 0x815   :  { %v2889_v5 = vpop.eup %2888 }
 0x816   :  { %v1200_v6 = vadd.f32 1.0, %v2889_v5 }
 0x818   :  { %2890 = vrcp.f32 %v1200_v6 }
 0x822   :  { %v2891_v10 = vpop.eup %2890 }
 0x823   :  { %v1214_v11 = vmul.f32 %v2891_v10, %v1193_v9 }
 0x825   :  { %1216 = vrot.lane.b32.xlu0 %v1214_v11, %s2992_s17 }
 0x879   :  { %v1205_v15 = vpop.permute.xlu1 %1204 }
 0x87a   :  { %v1207_v18 = vadd.f32 %v1205_v15, %v199_v16 }
 0x87c   :  { %v2269_v19 = vmul.f32 -1.442695, %v1207_v18 }
 0x897   :  { %v1217_v34 = vpop.permute.xlu0 %1216 }
 0x898   :  { %v1219_v13 = vadd.f32 %v1217_v34, %v215_v43 }
 0x89a   :  { %2892 = vtanh.f32 %v1219_v13 }
 0x89b   :  { %2894 = vpow2.f32 %v2269_v19 }
 0x8a4   :  { %v2893_v14 = vpop.eup %2892 }
 0x8a5   :  { %1223 = vrot.lane.b32.xlu0 %v2893_v14, %s2994_s30  ;;  %v2895_v20 = vpop.eup %2894 }
 0x8a6   :  { %v1211_v21 = vadd.f32 1.0, %v2895_v20 }
 0x8a8   :  { %2896 = vrcp.f32 %v1211_v21 }
 0x8b2   :  { %v2897_v23 = vpop.eup %2896 }
 0x8b3   :  { %v1221_v24 = vsub.f32 1.0, %v2897_v23  ;;  %v1227_v44 = vmul.f32 %v2897_v23, %v980_v56 }
 0x917   :  { %v1224_v25 = vpop.permute.xlu0 %1223 }
 0x918   :  { %v1226_v26 = vmul.f32 %v1224_v25, %v1221_v24 }
 0x91a   :  { %v1228_v28 = vadd.f32 %v1227_v44, %v1226_v26 }
 0x91c   :  { %1230 = vrot.lane.b32.xlu1 %v1228_v28, %s2994_s30 }
 0x98e   :  { %v1231_v30 = vpop.permute.xlu1 %1230 }
 0x98f   :  { %2577 = vmatmul.mubr.msk.f32.vlgmr.msra.gmra.mrb[18].mxu0 %vm234_vm2, %v1231_v30  ;;  %2588 = vmatmul.mubr.msk.f32.vlgmr.msra.gmra.mrb[14].mxu1 %vm234_vm2, %v1231_v30 }
 0x990   :  { %2790 = vmatpush3.bf16.msra.mxu0 %v3056_v17  ;;  %2598 = vmatprep.mubr.msk.f32.mxu0 %vm2990_vm0, %v2991_v1 }
 0x991   :  { %2791 = vmatprep.subr.bf16.mxu0 %v2989_v0  ;;  %2796 = vmatpush3.bf16.msra.mxu1 %v3045_v8 }
 0x992   :  { %2797 = vmatprep.subr.bf16.mxu1 %v2989_v0  ;;  %2609 = vmatprep.mubr.msk.f32.mxu1 %vm2990_vm0, %v2991_v1 }
 0x994   :  { %2793 = vmatpush3.bf16.msra.mxu0 %v3078_v27 }
 0x995   :  { %2800 = vmatprep.subr.bf16.mxu0 %v2989_v0  ;;  %2799 = vmatpush3.bf16.msra.mxu1 %v3052_v12 }
 0x996   :  { %2806 = vmatprep.subr.bf16.mxu1 %v2989_v0 }
 0x997   :  { %2599 = vmatmul.mubr.msk.f32.vlgmr.msra.gmra.mrb[20].mxu0 %vm234_vm2, %v1231_v30 }
 0x998   :  { %2802 = vmatpush3.bf16.msra.mxu0 %v3066_v22  ;;  %2620 = vmatprep.mubr.msk.f32.mxu0 %vm2990_vm0, %v2991_v1 }
 0x999   :  { %2803 = vmatprep.subr.bf16.mxu0 %v2989_v0 }
 0x99c   :  { %2805 = vmatpush3.bf16.msra.mxu0 %v3087_v29 }
 0x99d   :  { %2812 = vmatprep.subr.bf16.mxu0 %v2989_v0 }
 0xa62   :  { %v1300_v39 = vpop.f32.mrb[18].mxu0  ;;  %v1370_v31 = vpop.f32.mrb[14].mxu1 }
 0xa63   :  { %v1444_v32 = vadd.f32 %v1300_v39, %v3152_v49  ;;  %1452 = vrot.lane.b32.xlu1 %v1370_v31, %s2993_s24  ;;  %v2578_v33 = vpop.f32.mrb[19].mxu0  ;;  %v2589_v35 = vpop.f32.mrb[15].mxu1  ;;  %v216_v49 = vadd.f32 %v3172_v2, %v3146_v47  ;;  %v201_v39 = vadd.f32 %v3144_v46, %v3176_v7 }
 0xa65   :  { %v2273_v37 = vmul.f32 -1.442695, %v1444_v32 }
 0xa67   :  { %2898 = vpow2.f32 %v2273_v37 }
 0xa6a   :  { %v1440_v38 = vpop.f32.mrb[20].mxu0 }
 0xa6b   :  { %v2600_v40 = vpop.f32.mrb[21].mxu0  ;;  %v1441_v36 = vadd.f32 %v3168_v60, %v1440_v38 }
 0xa71   :  { %v2899_v41 = vpop.eup %2898 }
 0xa72   :  { %v1448_v45 = vadd.f32 1.0, %v2899_v41 }
 0xa74   :  { %2900 = vrcp.f32 %v1448_v45 }
 0xa7e   :  { %v2901_v50 = vpop.eup %2900 }
 0xa7f   :  { %v1462_v53 = vmul.f32 %v2901_v50, %v1441_v36 }
 0xa81   :  { %1464 = vrot.lane.b32.xlu0 %v1462_v53, %s2992_s17 }
 0xad5   :  { %v1453_v58 = vpop.permute.xlu1 %1452 }
 0xad6   :  { %v1455_v61 = vadd.f32 %v1453_v58, %v200_v59 }
 0xad8   :  { %v2274_v62 = vmul.f32 -1.442695, %v1455_v61 }
 0xaf3   :  { %v1465_v56 = vpop.permute.xlu0 %1464 }
 0xaf4   :  { %v1467_v57 = vadd.f32 %v1465_v56, %v216_v49 }
 0xaf6   :  { %2902 = vtanh.f32 %v1467_v57 }
 0xaf7   :  { %2904 = vpow2.f32 %v2274_v62 }
 0xb00   :  { %v2903_v42 = vpop.eup %2902 }
 0xb01   :  { %1471 = vrot.lane.b32.xlu0 %v2903_v42, %s2994_s30  ;;  %v2905_v63 = vpop.eup %2904 }
 0xb02   :  { %v1459_v3 = vadd.f32 1.0, %v2905_v63 }
 0xb04   :  { %2906 = vrcp.f32 %v1459_v3 }
 0xb0e   :  { %v2907_v4 = vpop.eup %2906 }
 0xb0f   :  { %v1469_v5 = vsub.f32 1.0, %v2907_v4  ;;  %v1475_v9 = vmul.f32 %v2907_v4, %v1228_v28 }
 0xb73   :  { %v1472_v6 = vpop.permute.xlu0 %1471 }
 0xb74   :  { %v1474_v10 = vmul.f32 %v1472_v6, %v1469_v5  ;;  %v202_v5 = vadd.f32 %v3176_v7, %v3157_v52 }
 0xb76   :  { %v1476_v11 = vadd.f32 %v1475_v9, %v1474_v10 }
 0xb78   :  { %1478 = vrot.lane.b32.xlu1 %v1476_v11, %s2994_s30 }
 0xbea   :  { %v1479_v43 = vpop.permute.xlu1 %1478 }
 0xbeb   :  { %2610 = vmatmul.mubr.msk.f32.vlgmr.msra.gmra.mrb[16].mxu1 %vm234_vm2, %v1479_v43  ;;  %2621 = vmatmul.mubr.msk.f32.vlgmr.msra.gmra.mrb[22].mxu0 %vm234_vm2, %v1479_v43 }
 0xbec   :  { %2808 = vmatpush3.bf16.msra.mxu1 %v3056_v17  ;;  %2631 = vmatprep.mubr.msk.f32.mxu1 %vm2990_vm0, %v2991_v1 }
 0xbed   :  { %2809 = vmatprep.subr.bf16.mxu1 %v2989_v0  ;;  %2814 = vmatpush3.bf16.msra.mxu0 %v3045_v8 }
 0xbee   :  { %2815 = vmatprep.subr.bf16.mxu0 %v2989_v0  ;;  %2642 = vmatprep.mubr.msk.f32.mxu0 %vm2990_vm0, %v2991_v1 }
 0xbf0   :  { %2811 = vmatpush3.bf16.msra.mxu1 %v3078_v27 }
 0xbf1   :  { %2818 = vmatprep.subr.bf16.mxu1 %v2989_v0  ;;  %2817 = vmatpush3.bf16.msra.mxu0 %v3052_v12 }
 0xbf2   :  { %2824 = vmatprep.subr.bf16.mxu0 %v2989_v0 }
 0xbf3   :  { %2632 = vmatmul.mubr.msk.f32.vlgmr.msra.gmra.mrb[18].mxu1 %vm234_vm2, %v1479_v43 }
 0xbf4   :  { %2820 = vmatpush3.bf16.msra.mxu1 %v3066_v22  ;;  %2653 = vmatprep.mubr.msk.f32.mxu1 %vm2990_vm0, %v2991_v1 }
 0xbf5   :  { %2821 = vmatprep.subr.bf16.mxu1 %v2989_v0 }
 0xbf8   :  { %2823 = vmatpush3.bf16.msra.mxu1 %v3087_v29 }
 0xbf9   :  { %2830 = vmatprep.subr.bf16.mxu1 %v2989_v0 }
 0xcbe   :  { %v1548_v47 = vpop.f32.mrb[16].mxu1  ;;  %v1618_v34 = vpop.f32.mrb[22].mxu0 }
 0xcbf   :  { %v1692_v13 = vadd.f32 %v1548_v47, %v3149_v48  ;;  %v2611_v14 = vpop.f32.mrb[17].mxu1  ;;  %1700 = vrot.lane.b32.xlu1 %v1618_v34, %s2993_s24  ;;  %v2622_v15 = vpop.f32.mrb[23].mxu0  ;;  %v217_v48 = vadd.f32 %v3144_v46, %v3172_v2 }
 0xcc1   :  { %v2278_v16 = vmul.f32 -1.442695, %v1692_v13 }
 0xcc3   :  { %2908 = vpow2.f32 %v2278_v16 }
 0xcc6   :  { %v1688_v18 = vpop.f32.mrb[18].mxu1 }
 0xcc7   :  { %v2633_v19 = vpop.f32.mrb[19].mxu1  ;;  %v1689_v23 = vadd.f32 %v3168_v60, %v1688_v18 }
 0xccd   :  { %v2909_v20 = vpop.eup %2908 }
 0xcce   :  { %v1696_v21 = vadd.f32 1.0, %v2909_v20 }
 0xcd0   :  { %2910 = vrcp.f32 %v1696_v21 }
 0xcda   :  { %v2911_v24 = vpop.eup %2910 }
 0xcdb   :  { %v1710_v25 = vmul.f32 %v2911_v24, %v1689_v23 }
 0xcdd   :  { %1712 = vrot.lane.b32.xlu0 %v1710_v25, %s2992_s17 }
 0xd31   :  { %v1701_v30 = vpop.permute.xlu1 %1700 }
 0xd32   :  { %v1703_v31 = vadd.f32 %v1701_v30, %v201_v39  ;;  %v203_v39 = vadd.f32 %v3154_v51, %v3176_v7 }
 0xd34   :  { %v2279_v32 = vmul.f32 -1.442695, %v1703_v31 }
 0xd4f   :  { %v1713_v26 = vpop.permute.xlu0 %1712 }
 0xd50   :  { %v1715_v44 = vadd.f32 %v1713_v26, %v217_v48 }
 0xd52   :  { %2912 = vtanh.f32 %v1715_v44 }
 0xd53   :  { %2914 = vpow2.f32 %v2279_v32 }
 0xd5c   :  { %v2913_v28 = vpop.eup %2912 }
 0xd5d   :  { %1719 = vrot.lane.b32.xlu0 %v2913_v28, %s2994_s30  ;;  %v2915_v33 = vpop.eup %2914 }
 0xd5e   :  { %v1707_v35 = vadd.f32 1.0, %v2915_v33 }
 0xd60   :  { %2916 = vrcp.f32 %v1707_v35 }
 0xd6a   :  { %v2917_v37 = vpop.eup %2916 }
 0xd6b   :  { %v1717_v38 = vsub.f32 1.0, %v2917_v37  ;;  %v1723_v45 = vmul.f32 %v2917_v37, %v1476_v11 }
 0xdcf   :  { %v1720_v40 = vpop.permute.xlu0 %1719 }
 0xdd0   :  { %v1722_v41 = vmul.f32 %v1720_v40, %v1717_v38 }
 0xdd2   :  { %v1724_v36 = vadd.f32 %v1723_v45, %v1722_v41 }
 0xdd4   :  { %1726 = vrot.lane.b32.xlu1 %v1724_v36, %s2994_s30 }
 0xe46   :  { %v1727_v50 = vpop.permute.xlu1 %1726 }
 0xe47   :  { %2643 = vmatmul.mubr.msk.f32.vlgmr.msra.gmra.mrb[24].mxu0 %vm234_vm2, %v1727_v50  ;;  %2654 = vmatmul.mubr.msk.f32.vlgmr.msra.gmra.mrb[20].mxu1 %vm234_vm2, %v1727_v50 }
 0xe48   :  { %2826 = vmatpush3.bf16.msra.mxu0 %v3056_v17  ;;  %2664 = vmatprep.mubr.msk.f32.mxu0 %vm2990_vm0, %v2991_v1 }
 0xe49   :  { %2827 = vmatprep.subr.bf16.mxu0 %v2989_v0  ;;  %2832 = vmatpush3.bf16.msra.mxu1 %v3045_v8 }
 0xe4a   :  { %2833 = vmatprep.subr.bf16.mxu1 %v2989_v0  ;;  %2675 = vmatprep.mubr.msk.f32.mxu1 %vm2990_vm0, %v2991_v1 }
 0xe4c   :  { %2829 = vmatpush3.bf16.msra.mxu0 %v3078_v27 }
 0xe4d   :  { %2836 = vmatprep.subr.bf16.mxu0 %v2989_v0  ;;  %2835 = vmatpush3.bf16.msra.mxu1 %v3052_v12 }
 0xe4e   :  { %2842 = vmatprep.subr.bf16.mxu1 %v2989_v0 }
 0xe4f   :  { %2665 = vmatmul.mubr.msk.f32.vlgmr.msra.gmra.mrb[26].mxu0 %vm234_vm2, %v1727_v50 }
 0xe50   :  { %2838 = vmatpush3.bf16.msra.mxu0 %v3066_v22  ;;  %2686 = vmatprep.mubr.msk.f32.mxu0 %vm2990_vm0, %v2991_v1 }
 0xe51   :  { %2839 = vmatprep.subr.bf16.mxu0 %v2989_v0 }
 0xe54   :  { %2841 = vmatpush3.bf16.msra.mxu0 %v3087_v29  ;;  %v218_v29 = vadd.f32 %v3172_v2, %v3157_v52 }
 0xf1a   :  { %v1796_v8 = vpop.f32.mrb[24].mxu0  ;;  %v1866_v46 = vpop.f32.mrb[20].mxu1 }
 0xf1b   :  { %v1940_v53 = vadd.f32 %v1796_v8, %v3163_v55  ;;  %1948 = vrot.lane.b32.xlu1 %v1866_v46, %s2993_s24  ;;  %v2644_v12 = vpop.f32.mrb[25].mxu0  ;;  %v2655_v49 = vpop.f32.mrb[21].mxu1 }
 0xf1d   :  { %v2283_v56 = vmul.f32 -1.442695, %v1940_v53 }
 0xf1f   :  { %2918 = vpow2.f32 %v2283_v56 }
 0xf22   :  { %v1936_v57 = vpop.f32.mrb[26].mxu0 }
 0xf23   :  { %v2666_v42 = vpop.f32.mrb[27].mxu0  ;;  %v1937_v59 = vadd.f32 %v3168_v60, %v1936_v57 }
 0xf29   :  { %v2919_v22 = vpop.eup %2918 }
 0xf2a   :  { %v1944_v58 = vadd.f32 1.0, %v2919_v22 }
 0xf2c   :  { %2920 = vrcp.f32 %v1944_v58 }
 0xf36   :  { %v2921_v61 = vpop.eup %2920 }
 0xf37   :  { %v1958_v62 = vmul.f32 %v2921_v61, %v1937_v59 }
 0xf39   :  { %1960 = vrot.lane.b32.xlu0 %v1958_v62, %s2992_s17 }
 0xf8d   :  { %v1949_v4 = vpop.permute.xlu1 %1948 }
 0xf8e   :  { %v1951_v6 = vadd.f32 %v1949_v4, %v202_v5 }
 0xf90   :  { %v2284_v9 = vmul.f32 -1.442695, %v1951_v6 }
 0xfab   :  { %v1961_v55 = vpop.permute.xlu0 %1960 }
 0xfac   :  { %v1963_v63 = vadd.f32 %v1961_v55, %v218_v29 }
 0xfae   :  { %2922 = vtanh.f32 %v1963_v63 }
 0xfaf   :  { %2924 = vpow2.f32 %v2284_v9 }
 0xfb8   :  { %v2923_v3 = vpop.eup %2922 }
 0xfb9   :  { %1967 = vrot.lane.b32.xlu0 %v2923_v3, %s2994_s30  ;;  %v2925_v10 = vpop.eup %2924 }
 0xfba   :  { %v1955_v11 = vadd.f32 1.0, %v2925_v10 }
 0xfbc   :  { %2926 = vrcp.f32 %v1955_v11 }
 0xfc6   :  { %v2927_v43 = vpop.eup %2926 }
 0xfc7   :  { %v1965_v47 = vsub.f32 1.0, %v2927_v43  ;;  %v1971_v13 = vmul.f32 %v2927_v43, %v1724_v36 }
0x102b   :  { %v1968_v34 = vpop.permute.xlu0 %1967 }
0x102c   :  { %v1970_v14 = vmul.f32 %v1968_v34, %v1965_v47 }
0x102e   :  { %v1972_v15 = vadd.f32 %v1971_v13, %v1970_v14 }
0x1030   :  { %1974 = vrot.lane.b32.xlu1 %v1972_v15, %s2994_s30 }
0x10a2   :  { %v1975_v16 = vpop.permute.xlu1 %1974 }
0x10a3   :  { %2676 = vmatmul.mubr.msk.f32.vlgmr.msra.gmra.mrb[22].mxu1 %vm234_vm2, %v1975_v16  ;;  %2687 = vmatmul.mubr.msk.f32.vlgmr.msra.gmra.mrb[28].mxu0 %vm234_vm2, %v1975_v16 }
0x10a4   :  { %2844 = vmatpush3.bf16.msra.mxu1 %v3056_v17  ;;  %2697 = vmatprep.mubr.msk.f32.mxu1 %vm2990_vm0, %v2991_v1 }
0x10a5   :  { %2845 = vmatprep.subr.bf16.mxu1 %v2989_v0 }
0x10a8   :  { %2847 = vmatpush3.bf16.msra.mxu1 %v3078_v27 }
0x10ab   :  { %2698 = vmatmul.mubr.msk.f32.vlgmr.msra.gmra.mrb[24].mxu1 %vm234_vm2, %v1975_v16 }
0x1176   :  { %v2044_v52 = vpop.f32.mrb[22].mxu1  ;;  %v2114_v18 = vpop.f32.mrb[28].mxu0 }
0x1177   :  { %v2188_v19 = vadd.f32 %v2044_v52, %v3160_v54  ;;  %2196 = vrot.lane.b32.xlu1 %v2114_v18, %s2993_s24  ;;  %v2677_v20 = vpop.f32.mrb[23].mxu1  ;;  %v2688_v21 = vpop.f32.mrb[29].mxu0  ;;  %v219_v54 = vadd.f32 %v3154_v51, %v3172_v2 }
0x1179   :  { %v2288_v23 = vmul.f32 -1.442695, %v2188_v19 }
0x117b   :  { %2928 = vpow2.f32 %v2288_v23 }
0x117e   :  { %v2184_v17 = vpop.f32.mrb[24].mxu1 }
0x117f   :  { %v2699_v24 = vpop.f32.mrb[25].mxu1  ;;  %v2185_v0 = vadd.f32 %v3168_v60, %v2184_v17 }
0x1185   :  { %v2929_v25 = vpop.eup %2928 }
0x1186   :  { %v2192_v1 = vadd.f32 1.0, %v2929_v25 }
0x1188   :  { %2930 = vrcp.f32 %v2192_v1 }
0x1192   :  { %v2931_v27 = vpop.eup %2930 }
0x1193   :  { %v2206_v48 = vmul.f32 %v2931_v27, %v2185_v0 }
0x1195   :  { %2208 = vrot.lane.b32.xlu0 %v2206_v48, %s2992_s17 }
0x11e9   :  { %v2197_v30 = vpop.permute.xlu1 %2196 }
0x11ea   :  { %v2199_v31 = vadd.f32 %v2197_v30, %v203_v39 }
0x11ec   :  { %v2289_v32 = vmul.f32 -1.442695, %v2199_v31 }
0x1207   :  { %v2209_v26 = vpop.permute.xlu0 %2208 }
0x1208   :  { %v2211_v44 = vadd.f32 %v2209_v26, %v219_v54 }
0x120a   :  { %2932 = vtanh.f32 %v2211_v44 }
0x120b   :  { %2934 = vpow2.f32 %v2289_v32 }
0x1214   :  { %v2933_v28 = vpop.eup %2932 }
0x1215   :  { %2215 = vrot.lane.b32.xlu0 %v2933_v28, %s2994_s30  ;;  %v2935_v60 = vpop.eup %2934 }
0x1216   :  { %v2203_v33 = vadd.f32 1.0, %v2935_v60 }
0x1218   :  { %2936 = vrcp.f32 %v2203_v33 }
0x1222   :  { %v2937_v35 = vpop.eup %2936 }
0x1223   :  { %v2213_v37 = vsub.f32 1.0, %v2937_v35  ;;  %v2219_v2 = vmul.f32 %v2937_v35, %v1972_v15 }
0x1287   :  { %v2216_v38 = vpop.permute.xlu0 %2215 }
0x1288   :  { %v2218_v40 = vmul.f32 %v2216_v38, %v2213_v37 }
0x128a   :  { %v2220_v41 = vadd.f32 %v2219_v2, %v2218_v40 }
0x128c   :  { %2222 = vrot.lane.b32.xlu1 %v2220_v41, %s2994_s30 }
0x12fe   :  { %v2223_v45 = vpop.permute.xlu1 %2222 }
0x12ff   :  { %2225 = vst.msk [vmem:[#allocation5] sm:$0xff] %vm234_vm2, %v2223_v45 }
0x1300   :  { %2971 = shalt.err (!%p2968_p12)
}
0x1301   :  { %s2972_s8 = scalar_lea.hbm %s3400_s4, 128 }
0x1302   :  { %p2973_p13 = scmp.ne.s32.totalorder %s3400_s4, %s2972_s8  ;;  %p2976_p0 = scmp.lt.u32.totalorder %s2972_s8, %s3400_s4 }
0x1304   :  { %p2978_p1 = pnand %p2976_p0, %p2973_p13 }
0x1306   :  { %2981 = shalt.err (!%p2978_p1)
}
0x1307   :  { %2235 = dma.vmem_to_hbm [thread:$0]  %s2233_s5, 128, %s3400_s4, [#allocation4]  }
0x1308   :  { %2984 = dma.done.wait [#allocation4], 128  }
0x1309   :  { %2985 = vsyncadd [#allocation4], 4294967168 }
0x130a   :  { %2239 = vsyncpa [#allocation3], 1 }
0x130b   :  { %2240 = vsyncpa [#allocation4], 1 }

</bundles_post_ra>
